<compile_context>
chip_gen: v5e
topology: v5e:2x2
jax: 0.10.0
libtpu: 0.0.40
codegen_flags: <defaults>
</compile_context>

<pallas_src>
import functools

import jax
import jax.numpy as jnp
from jax import lax
from jax.experimental import pallas as pl
from jax.experimental.pallas import tpu as pltpu


_LANE = 128      # f32 lane width
_SUBLANE = 8     # f32 sublane width


def _round_up(x, m):
    return (x + m - 1) // m * m


def _place(x, rows, cols, r_off=0, c_off=0):
    """Zero slab of (rows, cols) with `x` placed at (r_off, c_off)."""
    out = jnp.zeros((rows, cols), jnp.float32)
    return out.at[r_off:r_off + x.shape[0],
                  c_off:c_off + x.shape[1]].set(x.astype(jnp.float32))


# ---------------------------------------------------------------------------
# Fused kernel: VAE encoders -> (free concat via disjoint slots) -> PFA/graph
# -> GTCN
# ---------------------------------------------------------------------------

def end2end_kernel(x1_ref, x2_ref, x3_ref,
                   w1a_ref, b1a_ref, wma_ref, bma_ref,
                   w1b_ref, b1b_ref, wmb_ref, bmb_ref,
                   w1c_ref, b1c_ref, wmc_ref, bmc_ref,
                   gw1_ref, gb1_ref, gw2_ref, gb2_ref,
                   out_ref,
                   *, threshold, hop, n_real):
    f32 = jnp.float32

    def encode(x_ref, w1_ref, b1_ref, wm_ref, bm_ref):
        h = jnp.dot(x_ref[...], w1_ref[...], preferred_element_type=f32) + b1_ref[...]
        h = jnp.maximum(h, 0.0)
        return jnp.dot(h, wm_ref[...], preferred_element_type=f32) + bm_ref[...]

    # Each latent lands in its own disjoint column slot of a lane-padded slab.
    m1 = encode(x1_ref, w1a_ref, b1a_ref, wma_ref, bma_ref)
    m2 = encode(x2_ref, w1b_ref, b1b_ref, wmb_ref, bmb_ref)
    m3 = encode(x3_ref, w1c_ref, b1c_ref, wmc_ref, bmc_ref)

    # PFA_main: averaged cosine similarity across the three omics latents.
    # Normalize each slot separately, add, take ONE Gram matmul: because the
    # slots are disjoint columns, cross terms vanish and the Gram equals the sum
    # of the three per-omic cosine-similarity matrices.
    def normalize(m):
        return m * lax.rsqrt(jnp.sum(m * m, axis=-1, keepdims=True) + 1e-8)

    mn = normalize(m1) + normalize(m2) + normalize(m3)
    # Contract the LAST axis of both operands -> no materialized transpose.
    sim = lax.dot_general(mn, mn, (((1,), (1,)), ((), ())),
                          preferred_element_type=f32) * (1.0 / 3.0)

    n_pad = out_ref.shape[0]
    row = lax.broadcasted_iota(jnp.int32, (n_pad, n_pad), 0)
    col = lax.broadcasted_iota(jnp.int32, (n_pad, n_pad), 1)
    valid = jnp.logical_and(row < n_real, col < n_real)      # mask padded patients
    adj = jnp.where(jnp.logical_and(sim > threshold, valid), 1.0, 0.0)

    # get_GTCN_g: add self-loops, row-normalize (D^-1 A).
    eye = (row == col).astype(f32)
    a_hat = jnp.maximum(adj, eye)
    deg = jnp.sum(a_hat, axis=-1, keepdims=True)
    g = a_hat * pl.reciprocal(deg, approx=True)               # EUP slot; degrees are small ints

    # torch.cat([mean1, mean2, mean3], axis=1) == sum of disjoint-slot slabs.
    mean = m1 + m2 + m3

    # GTCN (eval mode: dropout = identity): h0 = relu(mean@W1+b1); hop x (h <- g@h + h0).
    h0 = jnp.dot(mean, gw1_ref[...], preferred_element_type=f32) + gb1_ref[...]
    h0 = jnp.maximum(h0, 0.0)
    h = h0
    for _ in range(hop):                                      # hop is a static Python int
        h = jnp.dot(g, h, preferred_element_type=f32) + h0
    out_ref[...] = jnp.dot(h, gw2_ref[...], preferred_element_type=f32) + gb2_ref[...]


# ---------------------------------------------------------------------------
# Wrapper: lane/sublane padding + single pallas_call
# ---------------------------------------------------------------------------

def end2end_forward(params, x1, x2, x3, threshold, hop):
    n = x1.shape[0]
    n_pad = _round_up(max(n, _SUBLANE), _SUBLANE)

    lats = (params["vae1"]["wm"].shape[1],
            params["vae2"]["wm"].shape[1],
            params["vae3"]["wm"].shape[1])
    lat_total = _round_up(sum(lats), _LANE)                 # shared latent slab width
    lat_offs = (0, lats[0], lats[0] + lats[1])              # torch.cat offsets

    gtcn = params["gtcn"]
    gtcn_hid = gtcn["w1"].shape[1]
    gtcn_out = gtcn["w2"].shape[1]
    hid_pad = _round_up(gtcn_hid, _LANE)
    out_pad = _round_up(gtcn_out, _LANE)

    padded = []

    # Inputs: rows padded to multiple of 8, feature dims to multiple of 128
    # (zeros -> exact, since the matching padded weight rows are zero).
    for x in (x1, x2, x3):
        padded.append(_place(x, n_pad, _round_up(x.shape[1], _LANE)))

    # VAE encoder params (only w1/b1/wm/bm feed the returned output).  The
    # mean-head columns are placed at the latent's cat-offset inside one shared
    # lane-padded slab, so concatenation becomes a vector add in the kernel.
    for name, off in zip(("vae1", "vae2", "vae3"), lat_offs):
        p = params[name]
        d_in, vh = p["w1"].shape
        d_in_pad = _round_up(d_in, _LANE)
        vh_pad = _round_up(vh, _LANE)
        padded.append(_place(p["w1"], d_in_pad, vh_pad))
        padded.append(_place(p["b1"], 1, vh_pad))
        padded.append(_place(p["wm"], vh_pad, lat_total, 0, off))
        padded.append(_place(p["bm"], 1, lat_total, 0, off))

    # GTCN params: W1 rows already line up with the cat offsets (no scatter needed).
    padded.append(_place(gtcn["w1"], lat_total, hid_pad))
    padded.append(_place(gtcn["b1"], 1, hid_pad))
    padded.append(_place(gtcn["w2"], hid_pad, out_pad))
    padded.append(_place(gtcn["b2"], 1, out_pad))

    # Explicit VMEM budget (inputs + output + latent/hidden temporaries + NxN
    # graph temporaries, with 2x headroom).
    total_bytes = sum(int(a.size) * 4 for a in padded)
    total_bytes += n_pad * out_pad * 4
    total_bytes += 6 * n_pad * max(lat_total, hid_pad) * 4
    total_bytes += 4 * n_pad * n_pad * 4
    vmem_limit = int(min(max(2 * total_bytes, 32 << 20), 64 << 20))

    vmem = pl.BlockSpec(memory_space=pltpu.MemorySpace.VMEM)
    kernel = functools.partial(
        end2end_kernel,
        threshold=float(threshold), hop=int(hop), n_real=int(n))

    out_padded = pl.pallas_call(
        kernel,
        out_shape=jax.ShapeDtypeStruct((n_pad, out_pad), jnp.float32),
        in_specs=[vmem] * len(padded),
        out_specs=vmem,
        compiler_params=pltpu.CompilerParams(vmem_limit_bytes=vmem_limit),
    )(*padded)

    return out_padded[:n, :gtcn_out]


# ---------------------------------------------------------------------------
# Deterministic parameter init (mirrors the nn.Linear structure)
# ---------------------------------------------------------------------------

def _init_linear(key, fan_in, fan_out):
    kw, kb = jax.random.split(key)
    scale = 1.0 / jnp.sqrt(jnp.float32(fan_in))
    w = jax.random.uniform(kw, (fan_in, fan_out), jnp.float32, -scale, scale)
    b = jax.random.uniform(kb, (1, fan_out), jnp.float32, -scale, scale)
    return w, b


def init_params(key, dna_in, rna_in, rppa_in, vae_hid, latents, gtcn_hid, gtcn_out):
    keys = jax.random.split(key, 16)
    params = {}
    for name, d_in, lat, k0 in (("vae1", dna_in, latents[0], 0),
                                ("vae2", rna_in, latents[1], 3),
                                ("vae3", rppa_in, latents[2], 6)):
        w1, b1 = _init_linear(keys[k0 + 0], d_in, vae_hid)
        wm, bm = _init_linear(keys[k0 + 1], vae_hid, lat)
        wv, bv = _init_linear(keys[k0 + 2], vae_hid, lat)   # log_var head (unused by output)
        params[name] = dict(w1=w1, b1=b1, wm=wm, bm=bm, wv=wv, bv=bv)
    n_in = sum(latents)
    gw1, gb1 = _init_linear(keys[9], n_in, gtcn_hid)
    gw2, gb2 = _init_linear(keys[10], gtcn_hid, gtcn_out)
    params["gtcn"] = dict(w1=gw1, b1=gb1, w2=gw2, b2=gb2)
    return params


# ---------------------------------------------------------------------------
# Main
# ---------------------------------------------------------------------------

if __name__ == "__main__":
    # Small shapes consistent with the module structure (scaled down from
    # DNA_IN/RNA_IN/RPPA_IN and GTCN n_in=320, n_hid=128, n_out=33).
    N = 8            # number of samples / graph nodes
    DNA_IN, RNA_IN, RPPA_IN = 64, 48, 32
    VAE_HID = 32
    LATENTS = (16, 8, 8)       # sum = GTCN n_in
    GTCN_HID = 16
    GTCN_OUT = 33
    THRESHOLD = 0.5
    HOP = 3

    key = jax.random.PRNGKey(0)
    k_par, k1, k2, k3 = jax.random.split(key, 4)
    params = init_params(k_par, DNA_IN, RNA_IN, RPPA_IN, VAE_HID, LATENTS,
                         GTCN_HID, GTCN_OUT)

    x1 = jax.random.normal(k1, (N, DNA_IN), jnp.float32)
    x2 = jax.random.normal(k2, (N, RNA_IN), jnp.float32)
    x3 = jax.random.normal(k3, (N, RPPA_IN), jnp.float32)

    fwd = jax.jit(functools.partial(end2end_forward, threshold=THRESHOLD, hop=HOP))
    out = fwd(params, x1, x2, x3)
    jax.block_until_ready(out)
    assert out.shape == (N, GTCN_OUT) and out.dtype == jnp.float32
    assert bool(jnp.all(jnp.isfinite(out)))
    print("KERNEL_OK")
</pallas_src>

<mosaic_0001>
module attributes {stable_mosaic.version = 11 : i64} {
  func.func @end2end_kernel(%arg0: memref<8x128xf32, #tpu.memory_space<vmem>>, %arg1: memref<8x128xf32, #tpu.memory_space<vmem>>, %arg2: memref<8x128xf32, #tpu.memory_space<vmem>>, %arg3: memref<128x128xf32, #tpu.memory_space<vmem>>, %arg4: memref<1x128xf32, #tpu.memory_space<vmem>>, %arg5: memref<128x128xf32, #tpu.memory_space<vmem>>, %arg6: memref<1x128xf32, #tpu.memory_space<vmem>>, %arg7: memref<128x128xf32, #tpu.memory_space<vmem>>, %arg8: memref<1x128xf32, #tpu.memory_space<vmem>>, %arg9: memref<128x128xf32, #tpu.memory_space<vmem>>, %arg10: memref<1x128xf32, #tpu.memory_space<vmem>>, %arg11: memref<128x128xf32, #tpu.memory_space<vmem>>, %arg12: memref<1x128xf32, #tpu.memory_space<vmem>>, %arg13: memref<128x128xf32, #tpu.memory_space<vmem>>, %arg14: memref<1x128xf32, #tpu.memory_space<vmem>>, %arg15: memref<128x128xf32, #tpu.memory_space<vmem>>, %arg16: memref<1x128xf32, #tpu.memory_space<vmem>>, %arg17: memref<128x128xf32, #tpu.memory_space<vmem>>, %arg18: memref<1x128xf32, #tpu.memory_space<vmem>>, %arg19: memref<8x128xf32, #tpu.memory_space<vmem>>) attributes {dimension_semantics = [], scalar_prefetch = 0 : i64, scratch_operands = 0 : i64, tpu.core_type = #tpu.core_type<tc>} {
    %c0 = arith.constant 0 : index
    %c0_0 = arith.constant 0 : index
    %0 = vector.load %arg0[%c0, %c0_0] : memref<8x128xf32, #tpu.memory_space<vmem>>, vector<8x128xf32>
    %c0_1 = arith.constant 0 : index
    %c0_2 = arith.constant 0 : index
    %1 = vector.load %arg3[%c0_1, %c0_2] : memref<128x128xf32, #tpu.memory_space<vmem>>, vector<128x128xf32>
    %cst = arith.constant dense<0.000000e+00> : vector<8x128xf32>
    %2 = tpu.matmul %0, %1, %cst {dimension_numbers = #tpu.dot_dimension_numbers<[1], [0], [0], [1], [0, 0, 1, 1], [], []>} : vector<8x128xf32>, vector<128x128xf32>, vector<8x128xf32> -> vector<8x128xf32>
    %c0_3 = arith.constant 0 : index
    %c0_4 = arith.constant 0 : index
    %3 = vector.load %arg4[%c0_3, %c0_4] : memref<1x128xf32, #tpu.memory_space<vmem>>, vector<1x128xf32>
    %4 = vector.broadcast %3 : vector<1x128xf32> to vector<8x128xf32>
    %5 = arith.addf %2, %4 : vector<8x128xf32>
    %cst_5 = arith.constant 0.000000e+00 : f32
    %6 = vector.broadcast %cst_5 : f32 to vector<8x128xf32>
    %7 = arith.maximumf %5, %6 : vector<8x128xf32>
    %c0_6 = arith.constant 0 : index
    %c0_7 = arith.constant 0 : index
    %8 = vector.load %arg5[%c0_6, %c0_7] : memref<128x128xf32, #tpu.memory_space<vmem>>, vector<128x128xf32>
    %cst_8 = arith.constant dense<0.000000e+00> : vector<8x128xf32>
    %9 = tpu.matmul %7, %8, %cst_8 {dimension_numbers = #tpu.dot_dimension_numbers<[1], [0], [0], [1], [0, 0, 1, 1], [], []>} : vector<8x128xf32>, vector<128x128xf32>, vector<8x128xf32> -> vector<8x128xf32>
    %c0_9 = arith.constant 0 : index
    %c0_10 = arith.constant 0 : index
    %10 = vector.load %arg6[%c0_9, %c0_10] : memref<1x128xf32, #tpu.memory_space<vmem>>, vector<1x128xf32>
    %11 = vector.broadcast %10 : vector<1x128xf32> to vector<8x128xf32>
    %12 = arith.addf %9, %11 : vector<8x128xf32>
    %c0_11 = arith.constant 0 : index
    %c0_12 = arith.constant 0 : index
    %13 = vector.load %arg1[%c0_11, %c0_12] : memref<8x128xf32, #tpu.memory_space<vmem>>, vector<8x128xf32>
    %c0_13 = arith.constant 0 : index
    %c0_14 = arith.constant 0 : index
    %14 = vector.load %arg7[%c0_13, %c0_14] : memref<128x128xf32, #tpu.memory_space<vmem>>, vector<128x128xf32>
    %cst_15 = arith.constant dense<0.000000e+00> : vector<8x128xf32>
    %15 = tpu.matmul %13, %14, %cst_15 {dimension_numbers = #tpu.dot_dimension_numbers<[1], [0], [0], [1], [0, 0, 1, 1], [], []>} : vector<8x128xf32>, vector<128x128xf32>, vector<8x128xf32> -> vector<8x128xf32>
    %c0_16 = arith.constant 0 : index
    %c0_17 = arith.constant 0 : index
    %16 = vector.load %arg8[%c0_16, %c0_17] : memref<1x128xf32, #tpu.memory_space<vmem>>, vector<1x128xf32>
    %17 = vector.broadcast %16 : vector<1x128xf32> to vector<8x128xf32>
    %18 = arith.addf %15, %17 : vector<8x128xf32>
    %cst_18 = arith.constant 0.000000e+00 : f32
    %19 = vector.broadcast %cst_18 : f32 to vector<8x128xf32>
    %20 = arith.maximumf %18, %19 : vector<8x128xf32>
    %c0_19 = arith.constant 0 : index
    %c0_20 = arith.constant 0 : index
    %21 = vector.load %arg9[%c0_19, %c0_20] : memref<128x128xf32, #tpu.memory_space<vmem>>, vector<128x128xf32>
    %cst_21 = arith.constant dense<0.000000e+00> : vector<8x128xf32>
    %22 = tpu.matmul %20, %21, %cst_21 {dimension_numbers = #tpu.dot_dimension_numbers<[1], [0], [0], [1], [0, 0, 1, 1], [], []>} : vector<8x128xf32>, vector<128x128xf32>, vector<8x128xf32> -> vector<8x128xf32>
    %c0_22 = arith.constant 0 : index
    %c0_23 = arith.constant 0 : index
    %23 = vector.load %arg10[%c0_22, %c0_23] : memref<1x128xf32, #tpu.memory_space<vmem>>, vector<1x128xf32>
    %24 = vector.broadcast %23 : vector<1x128xf32> to vector<8x128xf32>
    %25 = arith.addf %22, %24 : vector<8x128xf32>
    %c0_24 = arith.constant 0 : index
    %c0_25 = arith.constant 0 : index
    %26 = vector.load %arg2[%c0_24, %c0_25] : memref<8x128xf32, #tpu.memory_space<vmem>>, vector<8x128xf32>
    %c0_26 = arith.constant 0 : index
    %c0_27 = arith.constant 0 : index
    %27 = vector.load %arg11[%c0_26, %c0_27] : memref<128x128xf32, #tpu.memory_space<vmem>>, vector<128x128xf32>
    %cst_28 = arith.constant dense<0.000000e+00> : vector<8x128xf32>
    %28 = tpu.matmul %26, %27, %cst_28 {dimension_numbers = #tpu.dot_dimension_numbers<[1], [0], [0], [1], [0, 0, 1, 1], [], []>} : vector<8x128xf32>, vector<128x128xf32>, vector<8x128xf32> -> vector<8x128xf32>
    %c0_29 = arith.constant 0 : index
    %c0_30 = arith.constant 0 : index
    %29 = vector.load %arg12[%c0_29, %c0_30] : memref<1x128xf32, #tpu.memory_space<vmem>>, vector<1x128xf32>
    %30 = vector.broadcast %29 : vector<1x128xf32> to vector<8x128xf32>
    %31 = arith.addf %28, %30 : vector<8x128xf32>
    %cst_31 = arith.constant 0.000000e+00 : f32
    %32 = vector.broadcast %cst_31 : f32 to vector<8x128xf32>
    %33 = arith.maximumf %31, %32 : vector<8x128xf32>
    %c0_32 = arith.constant 0 : index
    %c0_33 = arith.constant 0 : index
    %34 = vector.load %arg13[%c0_32, %c0_33] : memref<128x128xf32, #tpu.memory_space<vmem>>, vector<128x128xf32>
    %cst_34 = arith.constant dense<0.000000e+00> : vector<8x128xf32>
    %35 = tpu.matmul %33, %34, %cst_34 {dimension_numbers = #tpu.dot_dimension_numbers<[1], [0], [0], [1], [0, 0, 1, 1], [], []>} : vector<8x128xf32>, vector<128x128xf32>, vector<8x128xf32> -> vector<8x128xf32>
    %c0_35 = arith.constant 0 : index
    %c0_36 = arith.constant 0 : index
    %36 = vector.load %arg14[%c0_35, %c0_36] : memref<1x128xf32, #tpu.memory_space<vmem>>, vector<1x128xf32>
    %37 = vector.broadcast %36 : vector<1x128xf32> to vector<8x128xf32>
    %38 = arith.addf %35, %37 : vector<8x128xf32>
    %39 = arith.mulf %12, %12 : vector<8x128xf32>
    %cst_37 = arith.constant dense<0.000000e+00> : vector<8xf32>
    %40 = vector.multi_reduction <add>, %39, %cst_37 [1] : vector<8x128xf32> to vector<8xf32>
    %41 = vector.shape_cast %40 : vector<8xf32> to vector<8x1xf32>
    %cst_38 = arith.constant 9.99999993E-9 : f32
    %42 = vector.broadcast %cst_38 : f32 to vector<8x1xf32>
    %43 = arith.addf %41, %42 : vector<8x1xf32>
    %44 = math.rsqrt %43 : vector<8x1xf32>
    %45 = vector.broadcast %44 : vector<8x1xf32> to vector<8x128xf32>
    %46 = arith.mulf %12, %45 : vector<8x128xf32>
    %47 = arith.mulf %25, %25 : vector<8x128xf32>
    %cst_39 = arith.constant dense<0.000000e+00> : vector<8xf32>
    %48 = vector.multi_reduction <add>, %47, %cst_39 [1] : vector<8x128xf32> to vector<8xf32>
    %49 = vector.shape_cast %48 : vector<8xf32> to vector<8x1xf32>
    %cst_40 = arith.constant 9.99999993E-9 : f32
    %50 = vector.broadcast %cst_40 : f32 to vector<8x1xf32>
    %51 = arith.addf %49, %50 : vector<8x1xf32>
    %52 = math.rsqrt %51 : vector<8x1xf32>
    %53 = vector.broadcast %52 : vector<8x1xf32> to vector<8x128xf32>
    %54 = arith.mulf %25, %53 : vector<8x128xf32>
    %55 = arith.addf %46, %54 : vector<8x128xf32>
    %56 = arith.mulf %38, %38 : vector<8x128xf32>
    %cst_41 = arith.constant dense<0.000000e+00> : vector<8xf32>
    %57 = vector.multi_reduction <add>, %56, %cst_41 [1] : vector<8x128xf32> to vector<8xf32>
    %58 = vector.shape_cast %57 : vector<8xf32> to vector<8x1xf32>
    %cst_42 = arith.constant 9.99999993E-9 : f32
    %59 = vector.broadcast %cst_42 : f32 to vector<8x1xf32>
    %60 = arith.addf %58, %59 : vector<8x1xf32>
    %61 = math.rsqrt %60 : vector<8x1xf32>
    %62 = vector.broadcast %61 : vector<8x1xf32> to vector<8x128xf32>
    %63 = arith.mulf %38, %62 : vector<8x128xf32>
    %64 = arith.addf %55, %63 : vector<8x128xf32>
    %cst_43 = arith.constant dense<0.000000e+00> : vector<8x8xf32>
    %65 = tpu.matmul %64, %64, %cst_43 {dimension_numbers = #tpu.dot_dimension_numbers<[1], [1], [0], [0], [0, 0, 1, 0], [], []>} : vector<8x128xf32>, vector<8x128xf32>, vector<8x8xf32> -> vector<8x8xf32>
    %cst_44 = arith.constant 0.333333343 : f32
    %66 = vector.broadcast %cst_44 : f32 to vector<8x8xf32>
    %67 = arith.mulf %65, %66 : vector<8x8xf32>
    %68 = tpu.iota {dimensions = array<i32: 0>} : vector<8x8xi32>
    %69 = tpu.iota {dimensions = array<i32: 1>} : vector<8x8xi32>
    %c8_i32 = arith.constant 8 : i32
    %70 = vector.broadcast %c8_i32 : i32 to vector<8x8xi32>
    %71 = arith.cmpi slt, %68, %70 : vector<8x8xi32>
    %c8_i32_45 = arith.constant 8 : i32
    %72 = vector.broadcast %c8_i32_45 : i32 to vector<8x8xi32>
    %73 = arith.cmpi slt, %69, %72 : vector<8x8xi32>
    %74 = arith.andi %71, %73 : vector<8x8xi1>
    %cst_46 = arith.constant 5.000000e-01 : f32
    %75 = vector.broadcast %cst_46 : f32 to vector<8x8xf32>
    %76 = arith.cmpf ogt, %67, %75 : vector<8x8xf32>
    %77 = arith.andi %76, %74 : vector<8x8xi1>
    %cst_47 = arith.constant 1.000000e+00 : f32
    %cst_48 = arith.constant 0.000000e+00 : f32
    %78 = vector.broadcast %cst_47 : f32 to vector<8x8xf32>
    %79 = vector.broadcast %cst_48 : f32 to vector<8x8xf32>
    %80 = arith.select %77, %78, %79 : vector<8x8xi1>, vector<8x8xf32>
    %81 = arith.cmpi eq, %68, %69 : vector<8x8xi32>
    %82 = arith.extui %81 : vector<8x8xi1> to vector<8x8xi32>
    %83 = arith.sitofp %82 : vector<8x8xi32> to vector<8x8xf32>
    %84 = arith.maximumf %80, %83 : vector<8x8xf32>
    %cst_49 = arith.constant dense<0.000000e+00> : vector<8xf32>
    %85 = vector.multi_reduction <add>, %84, %cst_49 [1] : vector<8x8xf32> to vector<8xf32>
    %86 = vector.shape_cast %85 : vector<8xf32> to vector<8x1xf32>
    %87 = tpu.reciprocal %86 {approx = true} : vector<8x1xf32> -> vector<8x1xf32>
    %88 = vector.broadcast %87 : vector<8x1xf32> to vector<8x8xf32>
    %89 = arith.mulf %84, %88 : vector<8x8xf32>
    %90 = arith.addf %12, %25 : vector<8x128xf32>
    %91 = arith.addf %90, %38 : vector<8x128xf32>
    %c0_50 = arith.constant 0 : index
    %c0_51 = arith.constant 0 : index
    %92 = vector.load %arg15[%c0_50, %c0_51] : memref<128x128xf32, #tpu.memory_space<vmem>>, vector<128x128xf32>
    %cst_52 = arith.constant dense<0.000000e+00> : vector<8x128xf32>
    %93 = tpu.matmul %91, %92, %cst_52 {dimension_numbers = #tpu.dot_dimension_numbers<[1], [0], [0], [1], [0, 0, 1, 1], [], []>} : vector<8x128xf32>, vector<128x128xf32>, vector<8x128xf32> -> vector<8x128xf32>
    %c0_53 = arith.constant 0 : index
    %c0_54 = arith.constant 0 : index
    %94 = vector.load %arg16[%c0_53, %c0_54] : memref<1x128xf32, #tpu.memory_space<vmem>>, vector<1x128xf32>
    %95 = vector.broadcast %94 : vector<1x128xf32> to vector<8x128xf32>
    %96 = arith.addf %93, %95 : vector<8x128xf32>
    %cst_55 = arith.constant 0.000000e+00 : f32
    %97 = vector.broadcast %cst_55 : f32 to vector<8x128xf32>
    %98 = arith.maximumf %96, %97 : vector<8x128xf32>
    %cst_56 = arith.constant dense<0.000000e+00> : vector<8x128xf32>
    %99 = tpu.matmul %89, %98, %cst_56 {dimension_numbers = #tpu.dot_dimension_numbers<[1], [0], [0], [1], [0, 0, 1, 1], [], []>} : vector<8x8xf32>, vector<8x128xf32>, vector<8x128xf32> -> vector<8x128xf32>
    %100 = arith.addf %99, %98 : vector<8x128xf32>
    %cst_57 = arith.constant dense<0.000000e+00> : vector<8x128xf32>
    %101 = tpu.matmul %89, %100, %cst_57 {dimension_numbers = #tpu.dot_dimension_numbers<[1], [0], [0], [1], [0, 0, 1, 1], [], []>} : vector<8x8xf32>, vector<8x128xf32>, vector<8x128xf32> -> vector<8x128xf32>
    %102 = arith.addf %101, %98 : vector<8x128xf32>
    %cst_58 = arith.constant dense<0.000000e+00> : vector<8x128xf32>
    %103 = tpu.matmul %89, %102, %cst_58 {dimension_numbers = #tpu.dot_dimension_numbers<[1], [0], [0], [1], [0, 0, 1, 1], [], []>} : vector<8x8xf32>, vector<8x128xf32>, vector<8x128xf32> -> vector<8x128xf32>
    %104 = arith.addf %103, %98 : vector<8x128xf32>
    %c0_59 = arith.constant 0 : index
    %c0_60 = arith.constant 0 : index
    %105 = vector.load %arg17[%c0_59, %c0_60] : memref<128x128xf32, #tpu.memory_space<vmem>>, vector<128x128xf32>
    %cst_61 = arith.constant dense<0.000000e+00> : vector<8x128xf32>
    %106 = tpu.matmul %104, %105, %cst_61 {dimension_numbers = #tpu.dot_dimension_numbers<[1], [0], [0], [1], [0, 0, 1, 1], [], []>} : vector<8x128xf32>, vector<128x128xf32>, vector<8x128xf32> -> vector<8x128xf32>
    %c0_62 = arith.constant 0 : index
    %c0_63 = arith.constant 0 : index
    %107 = vector.load %arg18[%c0_62, %c0_63] : memref<1x128xf32, #tpu.memory_space<vmem>>, vector<1x128xf32>
    %108 = vector.broadcast %107 : vector<1x128xf32> to vector<8x128xf32>
    %109 = arith.addf %106, %108 : vector<8x128xf32>
    %c0_64 = arith.constant 0 : index
    %c0_65 = arith.constant 0 : index
    %110 = vector.load %arg19[%c0_64, %c0_65] : memref<8x128xf32, #tpu.memory_space<vmem>>, vector<8x128xf32>
    tpu.vector_store %arg19[%c0_64, %c0_65], %109 {strides = array<i32>} : memref<8x128xf32, #tpu.memory_space<vmem>>, vector<8x128xf32>,
    return
  }
}

</mosaic_0001>

<bundles_post_ra>
// kernel: end2end_forward.1
= control target key start
LH: loop header
LB: loop body
LE: loop exit
PB: predicated region body
PF: predicated region fallthrough
CT: control target
= control target key end

     0   :  { %s1140_s0 = inlined_call_operand.vmem [shape: f32[8,128], index: 0, kind: input, shape index: {}]   ;;  %s1141_s1 = inlined_call_operand.vmem [shape: f32[8,128], index: 1, kind: input, shape index: {}]   ;;  %s1142_s2 = inlined_call_operand.vmem [shape: f32[8,128], index: 2, kind: input, shape index: {}]   ;;  %s1143_s3 = inlined_call_operand.vmem [shape: f32[128,128], index: 3, kind: input, shape index: {}]   ;;  %s1144_s4 = inlined_call_operand.vmem [shape: f32[1,128], index: 4, kind: input, shape index: {}]   ;;  %s1145_s5 = inlined_call_operand.vmem [shape: f32[128,128], index: 5, kind: input, shape index: {}]   ;;  %s1146_s6 = inlined_call_operand.vmem [shape: f32[1,128], index: 6, kind: input, shape index: {}]   ;;  %s1147_s7 = inlined_call_operand.vmem [shape: f32[128,128], index: 7, kind: input, shape index: {}]   ;;  %s1148_s8 = inlined_call_operand.vmem [shape: f32[1,128], index: 8, kind: input, shape index: {}]   ;;  %s1149_s9 = inlined_call_operand.vmem [shape: f32[128,128], index: 9, kind: input, shape index: {}]   ;;  %s1150_s10 = inlined_call_operand.vmem [shape: f32[1,128], index: 10, kind: input, shape index: {}]   ;;  %s1151_s11 = inlined_call_operand.vmem [shape: f32[128,128], index: 11, kind: input, shape index: {}]   ;;  %s1152_s12 = inlined_call_operand.vmem [shape: f32[1,128], index: 12, kind: input, shape index: {}]   ;;  %s1153_s13 = inlined_call_operand.vmem [shape: f32[128,128], index: 13, kind: input, shape index: {}]   ;;  %s1154_s14 = inlined_call_operand.vmem [shape: f32[1,128], index: 14, kind: input, shape index: {}]   ;;  %s1155_s15 = inlined_call_operand.vmem [shape: f32[128,128], index: 15, kind: input, shape index: {}]   ;;  %s1156_s16 = inlined_call_operand.vmem [shape: f32[1,128], index: 16, kind: input, shape index: {}]   ;;  %s1157_s17 = inlined_call_operand.vmem [shape: f32[128,128], index: 17, kind: input, shape index: {}]   ;;  %s1158_s18 = inlined_call_operand.vmem [shape: f32[1,128], index: 18, kind: input, shape index: {}]   ;;  %s1159_s19 = inlined_call_operand.hbm [shape: f32[8,128], index: 19, kind: output, shape index: {}]  }
   0x1   :  { %1161 = sst [smem:[#allocation5_spill]] %s1140_s0 }
   0x2   :  { %1162 = sst [smem:[#allocation6_spill]] %s1141_s1 }
   0x3   :  { %1163 = sst [smem:[#allocation7_spill]] %s1142_s2 }
   0x4   :  { %1164 = sst [smem:[#allocation8_spill]] %s1143_s3 }
   0x5   :  { %s1165_s20 = sld [smem:[#allocation8_spill]]  ;;  %v161_v1 = vld [vmem:[%s1147_s7 + $0x78] sm:$0xff]  ;;  %v160_v3 = vld [vmem:[%s1147_s7 + $0x70] sm:$0xff]  ;;  %v159_v5 = vld [vmem:[%s1147_s7 + $0x68] sm:$0xff] }
   0x6   :  { %166 = vmatpush.msra.mxu2 %v161_v1  ;;  %v158_v7 = vld [vmem:[%s1147_s7 + $0x60] sm:$0xff]  ;;  %v157_v9 = vld [vmem:[%s1147_s7 + $0x58] sm:$0xff]  ;;  %v156_v11 = vld [vmem:[%s1147_s7 + $0x50] sm:$0xff] }
   0x7   :  { %v155_v13 = vld [vmem:[%s1147_s7 + $0x48] sm:$0xff]  ;;  %v154_v15 = vld [vmem:[%s1147_s7 + $0x40] sm:$0xff]  ;;  %v153_v17 = vld [vmem:[%s1147_s7 + $0x38] sm:$0xff] }
   0x8   :  { %167 = vmatpush.msra.mxu2 %v160_v3  ;;  %v152_v19 = vld [vmem:[%s1147_s7 + $0x30] sm:$0xff] }
   0xa   :  { %168 = vmatpush.msra.mxu2 %v159_v5 }
   0xb   :  { %v79_v0 = vld [vmem:[%s1165_s20 + $0x78] sm:$0xff]  ;;  %v78_v2 = vld [vmem:[%s1165_s20 + $0x70] sm:$0xff]  ;;  %v77_v4 = vld [vmem:[%s1165_s20 + $0x68] sm:$0xff] }
   0xc   :  { %84 = vmatpush.msra.mxu0 %v79_v0  ;;  %v76_v6 = vld [vmem:[%s1165_s20 + $0x60] sm:$0xff]  ;;  %v75_v8 = vld [vmem:[%s1165_s20 + $0x58] sm:$0xff]  ;;  %169 = vmatpush.msra.mxu2 %v158_v7  ;;  %v74_v10 = vld [vmem:[%s1165_s20 + $0x50] sm:$0xff] }
   0xd   :  { %v73_v12 = vld [vmem:[%s1165_s20 + $0x48] sm:$0xff]  ;;  %v72_v14 = vld [vmem:[%s1165_s20 + $0x40] sm:$0xff]  ;;  %v71_v16 = vld [vmem:[%s1165_s20 + $0x38] sm:$0xff] }
   0xe   :  { %85 = vmatpush.msra.mxu0 %v78_v2  ;;  %170 = vmatpush.msra.mxu2 %v157_v9  ;;  %v70_v18 = vld [vmem:[%s1165_s20 + $0x30] sm:$0xff] }
  0x10   :  { %86 = vmatpush.msra.mxu0 %v77_v4  ;;  %171 = vmatpush.msra.mxu2 %v156_v11 }
  0x12   :  { %87 = vmatpush.msra.mxu0 %v76_v6  ;;  %172 = vmatpush.msra.mxu2 %v155_v13 }
  0x14   :  { %88 = vmatpush.msra.mxu0 %v75_v8  ;;  %173 = vmatpush.msra.mxu2 %v154_v15 }
  0x16   :  { %89 = vmatpush.msra.mxu0 %v74_v10  ;;  %174 = vmatpush.msra.mxu2 %v153_v17 }
  0x18   :  { %90 = vmatpush.msra.mxu0 %v73_v12 }
  0x1a   :  { %91 = vmatpush.msra.mxu0 %v72_v14 }
  0x1c   :  { %92 = vmatpush.msra.mxu0 %v71_v16 }
  0x1d   :  { %24 = vsyncpa [#allocation3], 0  ;;  %v69_v20 = vld [vmem:[%s1165_s20 + $0x28] sm:$0xff]  ;;  %175 = vmatpush.msra.mxu2 %v152_v19  ;;  %v68_v22 = vld [vmem:[%s1165_s20 + $0x20] sm:$0xff]  ;;  %s1166_s26 = sld [smem:[#allocation5_spill]]  ;;  %vm391_vm13 = vcmask 64512  }
  0x1e   :  { %v151_v21 = vld [vmem:[%s1147_s7 + $0x28] sm:$0xff]  ;;  %93 = vmatpush.msra.mxu0 %v70_v18  ;;  %v150_v23 = vld [vmem:[%s1147_s7 + $0x20] sm:$0xff]  ;;  %v67_v24 = vld [vmem:[%s1165_s20 + $0x18] sm:$0xff]  ;;  %s1167_s29 = sld [smem:[#allocation6_spill]] }
  0x1f   :  { %176 = vmatpush.msra.mxu2 %v151_v21  ;;  %v149_v25 = vld [vmem:[%s1147_s7 + $0x18] sm:$0xff]  ;;  %v66_v26 = vld [vmem:[%s1165_s20 + $0x10] sm:$0xff]  ;;  %v65_v28 = vld [vmem:[%s1165_s20 + $0x8] sm:$0xff]  ;;  %s1168_s0 = sld [smem:[#allocation7_spill]] }
  0x20   :  { %94 = vmatpush.msra.mxu0 %v69_v20  ;;  %v148_v27 = vld [vmem:[%s1147_s7 + $0x10] sm:$0xff]  ;;  %v147_v29 = vld [vmem:[%s1147_s7 + $0x8] sm:$0xff]  ;;  %v64_v30 = vld [vmem:[%s1165_s20] sm:$0xff] }
  0x21   :  { %177 = vmatpush.msra.mxu2 %v150_v23  ;;  %v146_v31 = vld [vmem:[%s1147_s7] sm:$0xff]  ;;  %v243_v34 = vld [vmem:[%s1151_s11 + $0x78] sm:$0xff]  ;;  %v242_v35 = vld [vmem:[%s1151_s11 + $0x70] sm:$0xff] }
  0x22   :  { %95 = vmatpush.msra.mxu0 %v68_v22  ;;  %v120_v36 = vld [vmem:[%s1145_s5 + $0x78] sm:$0xff]  ;;  %v119_v37 = vld [vmem:[%s1145_s5 + $0x70] sm:$0xff]  ;;  %v241_v39 = vld [vmem:[%s1151_s11 + $0x68] sm:$0xff] }
  0x23   :  { %178 = vmatpush.msra.mxu2 %v149_v25  ;;  %v63_v32 = vld [vmem:[%s1166_s26] sm:$0xff]  ;;  %125 = vmatpush.msra.mxu1 %v120_v36  ;;  %v202_v38 = vld [vmem:[%s1149_s9 + $0x78] sm:$0xff]  ;;  %v118_v40 = vld [vmem:[%s1145_s5 + $0x68] sm:$0xff] }
  0x24   :  { %96 = vmatpush.msra.mxu0 %v67_v24  ;;  %v145_v33 = vld [vmem:[%s1167_s29] sm:$0xff]  ;;  %207 = vmatpush.msra.mxu3 %v202_v38  ;;  %v201_v41 = vld [vmem:[%s1149_s9 + $0x70] sm:$0xff]  ;;  %v200_v42 = vld [vmem:[%s1149_s9 + $0x68] sm:$0xff] }
  0x25   :  { %179 = vmatpush.msra.mxu2 %v148_v27  ;;  %126 = vmatpush.msra.mxu1 %v119_v37  ;;  %v240_v43 = vld [vmem:[%s1151_s11 + $0x60] sm:$0xff]  ;;  %v239_v46 = vld [vmem:[%s1151_s11 + $0x58] sm:$0xff]  ;;  %v238_v49 = vld [vmem:[%s1151_s11 + $0x50] sm:$0xff] }
  0x26   :  { %97 = vmatpush.msra.mxu0 %v66_v26  ;;  %v117_v44 = vld [vmem:[%s1145_s5 + $0x60] sm:$0xff]  ;;  %208 = vmatpush.msra.mxu3 %v201_v41  ;;  %v116_v47 = vld [vmem:[%s1145_s5 + $0x58] sm:$0xff]  ;;  %v115_v50 = vld [vmem:[%s1145_s5 + $0x50] sm:$0xff] }
  0x27   :  { %180 = vmatpush.msra.mxu2 %v147_v29  ;;  %127 = vmatpush.msra.mxu1 %v118_v40  ;;  %v199_v45 = vld [vmem:[%s1149_s9 + $0x60] sm:$0xff]  ;;  %v198_v48 = vld [vmem:[%s1149_s9 + $0x58] sm:$0xff]  ;;  %v197_v51 = vld [vmem:[%s1149_s9 + $0x50] sm:$0xff] }
  0x28   :  { %98 = vmatpush.msra.mxu0 %v65_v28  ;;  %209 = vmatpush.msra.mxu3 %v200_v42  ;;  %v237_v52 = vld [vmem:[%s1151_s11 + $0x48] sm:$0xff]  ;;  %v236_v55 = vld [vmem:[%s1151_s11 + $0x40] sm:$0xff]  ;;  %v235_v58 = vld [vmem:[%s1151_s11 + $0x38] sm:$0xff] }
  0x29   :  { %181 = vmatpush.msra.mxu2 %v146_v31  ;;  %128 = vmatpush.msra.mxu1 %v117_v44  ;;  %v114_v53 = vld [vmem:[%s1145_s5 + $0x48] sm:$0xff]  ;;  %v113_v56 = vld [vmem:[%s1145_s5 + $0x40] sm:$0xff]  ;;  %v112_v59 = vld [vmem:[%s1145_s5 + $0x38] sm:$0xff] }
  0x2a   :  { %99 = vmatpush.msra.mxu0 %v64_v30  ;;  %182 = vmatmul.f32.vlgmr.msra.gmra.mxu2 %v145_v33  ;;  %v196_v54 = vld [vmem:[%s1149_s9 + $0x48] sm:$0xff]  ;;  %v195_v57 = vld [vmem:[%s1149_s9 + $0x40] sm:$0xff]  ;;  %v194_v60 = vld [vmem:[%s1149_s9 + $0x38] sm:$0xff] }
  0x2b   :  { %100 = vmatmul.f32.vlgmr.msra.gmra.mxu0 %v63_v32  ;;  %210 = vmatpush.msra.mxu3 %v199_v45  ;;  %v234_v61 = vld [vmem:[%s1151_s11 + $0x30] sm:$0xff]  ;;  %v233_v0 = vld [vmem:[%s1151_s11 + $0x28] sm:$0xff]  ;;  %v232_v2 = vld [vmem:[%s1151_s11 + $0x20] sm:$0xff] }
  0x2c   :  { %248 = vmatpush.msrb.mxu0 %v243_v34  ;;  %129 = vmatpush.msra.mxu1 %v116_v47  ;;  %v111_v62 = vld [vmem:[%s1145_s5 + $0x30] sm:$0xff]  ;;  %v110_v1 = vld [vmem:[%s1145_s5 + $0x28] sm:$0xff]  ;;  %v109_v3 = vld [vmem:[%s1145_s5 + $0x20] sm:$0xff] }
  0x2d   :  { %211 = vmatpush.msra.mxu3 %v198_v48  ;;  %v193_v63 = vld [vmem:[%s1149_s9 + $0x30] sm:$0xff]  ;;  %v231_v4 = vld [vmem:[%s1151_s11 + $0x18] sm:$0xff]  ;;  %v229_v7 = vld [vmem:[%s1151_s11 + $0x8] sm:$0xff] }
  0x2e   :  { %249 = vmatpush.msrb.mxu0 %v242_v35  ;;  %130 = vmatpush.msra.mxu1 %v115_v50  ;;  %v108_v5 = vld [vmem:[%s1145_s5 + $0x18] sm:$0xff]  ;;  %v230_v6 = vld [vmem:[%s1151_s11 + $0x10] sm:$0xff]  ;;  %v228_v8 = vld [vmem:[%s1151_s11] sm:$0xff] }
  0x2f   :  { %212 = vmatpush.msra.mxu3 %v197_v51  ;;  %v227_v9 = vld [vmem:[%s1168_s0] sm:$0xff]  ;;  %v107_v10 = vld [vmem:[%s1145_s5 + $0x10] sm:$0xff]  ;;  %v192_v11 = vld [vmem:[%s1149_s9 + $0x28] sm:$0xff]  ;;  %s551_s0 = sshll.u32 %s1159_s19, 4  ;;  %s552_s0 = int_to_ptr.hbm [resolvable:$true] %s551_s0 }
  0x30   :  { %250 = vmatpush.msrb.mxu0 %v241_v39  ;;  %131 = vmatpush.msra.mxu1 %v114_v53  ;;  %v106_v12 = vld [vmem:[%s1145_s5 + $0x8] sm:$0xff]  ;;  %v191_v13 = vld [vmem:[%s1149_s9 + $0x20] sm:$0xff]  ;;  %v190_v15 = vld [vmem:[%s1149_s9 + $0x18] sm:$0xff] }
  0x31   :  { %213 = vmatpush.msra.mxu3 %v196_v54  ;;  %v105_v14 = vld [vmem:[%s1145_s5] sm:$0xff]  ;;  %v284_v16 = vld [vmem:[%s1153_s13 + $0x78] sm:$0xff]  ;;  %v189_v17 = vld [vmem:[%s1149_s9 + $0x10] sm:$0xff] }
  0x32   :  { %251 = vmatpush.msrb.mxu0 %v240_v43  ;;  %132 = vmatpush.msra.mxu1 %v113_v56  ;;  %v283_v18 = vld [vmem:[%s1153_s13 + $0x70] sm:$0xff]  ;;  %v188_v19 = vld [vmem:[%s1149_s9 + $0x8] sm:$0xff]  ;;  %v187_v21 = vld [vmem:[%s1149_s9] sm:$0xff]  ;;  %s609_s9 = smov [#allocation2]  }
  0x33   :  { %214 = vmatpush.msra.mxu3 %v195_v57  ;;  %v282_v20 = vld [vmem:[%s1153_s13 + $0x68] sm:$0xff]  ;;  %v281_v22 = vld [vmem:[%s1153_s13 + $0x60] sm:$0xff]  ;;  %v280_v23 = vld [vmem:[%s1153_s13 + $0x58] sm:$0xff]  ;;  %s549_s28 = sshll.u32 %s609_s9, 4  ;;  %s550_s28 = int_to_ptr.vmem [resolvable:$true] %s549_s28 }
  0x34   :  { %252 = vmatpush.msrb.mxu0 %v239_v46  ;;  %133 = vmatpush.msra.mxu1 %v112_v59  ;;  %v279_v24 = vld [vmem:[%s1153_s13 + $0x50] sm:$0xff]  ;;  %v278_v25 = vld [vmem:[%s1153_s13 + $0x48] sm:$0xff]  ;;  %v277_v26 = vld [vmem:[%s1153_s13 + $0x40] sm:$0xff] }
  0x35   :  { %215 = vmatpush.msra.mxu3 %v194_v60  ;;  %v276_v27 = vld [vmem:[%s1153_s13 + $0x38] sm:$0xff]  ;;  %v275_v28 = vld [vmem:[%s1153_s13 + $0x30] sm:$0xff]  ;;  %v274_v29 = vld [vmem:[%s1153_s13 + $0x28] sm:$0xff] }
  0x36   :  { %253 = vmatpush.msrb.mxu0 %v238_v49  ;;  %134 = vmatpush.msra.mxu1 %v111_v62  ;;  %v273_v30 = vld [vmem:[%s1153_s13 + $0x20] sm:$0xff]  ;;  %v272_v31 = vld [vmem:[%s1153_s13 + $0x18] sm:$0xff]  ;;  %v271_v33 = vld [vmem:[%s1153_s13 + $0x10] sm:$0xff] }
  0x37   :  { %216 = vmatpush.msra.mxu3 %v193_v63  ;;  %v566_v32 = vld [vmem:[%s1144_s4] ss:$0 sm:$0xff]  ;;  %v270_v36 = vld [vmem:[%s1153_s13 + $0x8] sm:$0xff]  ;;  %v414_v47 = vld [vmem:[%s1155_s15 + $0x78] sm:$0xff] }
  0x38   :  { %254 = vmatpush.msrb.mxu0 %v237_v52  ;;  %135 = vmatpush.msra.mxu1 %v110_v1  ;;  %v567_v38 = vld [vmem:[%s1148_s8] ss:$0 sm:$0xff]  ;;  %v413_v48 = vld [vmem:[%s1155_s15 + $0x70] sm:$0xff]  ;;  %v412_v49 = vld [vmem:[%s1155_s15 + $0x68] sm:$0xff] }
  0x39   :  { %217 = vmatpush.msra.mxu3 %v192_v11  ;;  %v269_v39 = vld [vmem:[%s1153_s13] sm:$0xff]  ;;  %v410_v51 = vld [vmem:[%s1155_s15 + $0x58] sm:$0xff]  ;;  %v409_v52 = vld [vmem:[%s1155_s15 + $0x50] sm:$0xff] }
  0x3a   :  { %255 = vmatpush.msrb.mxu0 %v236_v55  ;;  %136 = vmatpush.msra.mxu1 %v109_v3  ;;  %v568_v43 = vld [vmem:[%s1152_s12] ss:$0 sm:$0xff]  ;;  %v408_v53 = vld [vmem:[%s1155_s15 + $0x48] sm:$0xff]  ;;  %v406_v55 = vld [vmem:[%s1155_s15 + $0x38] sm:$0xff] }
  0x3b   :  { %218 = vmatpush.msra.mxu3 %v191_v13  ;;  %v411_v50 = vld [vmem:[%s1155_s15 + $0x60] sm:$0xff]  ;;  %v405_v56 = vld [vmem:[%s1155_s15 + $0x30] sm:$0xff]  ;;  %v404_v57 = vld [vmem:[%s1155_s15 + $0x28] sm:$0xff] }
  0x3c   :  { %256 = vmatpush.msrb.mxu0 %v235_v58  ;;  %137 = vmatpush.msra.mxu1 %v108_v5  ;;  %v407_v54 = vld [vmem:[%s1155_s15 + $0x40] sm:$0xff]  ;;  %v402_v59 = vld [vmem:[%s1155_s15 + $0x18] sm:$0xff] }
  0x3d   :  { %219 = vmatpush.msra.mxu3 %v190_v15  ;;  %v403_v58 = vld [vmem:[%s1155_s15 + $0x20] sm:$0xff] }
  0x3e   :  { %257 = vmatpush.msrb.mxu0 %v234_v61  ;;  %138 = vmatpush.msra.mxu1 %v107_v10  ;;  %v569_v60 = vld [vmem:[%s1146_s6] ss:$0 sm:$0xff]  ;;  %v401_v61 = vld [vmem:[%s1155_s15 + $0x10] sm:$0xff] }
  0x3f   :  { %220 = vmatpush.msra.mxu3 %v189_v17  ;;  %v399_v1 = vld [vmem:[%s1155_s15] sm:$0xff] }
  0x40   :  { %258 = vmatpush.msrb.mxu0 %v233_v0  ;;  %139 = vmatpush.msra.mxu1 %v106_v12  ;;  %v400_v0 = vld [vmem:[%s1155_s15 + $0x8] sm:$0xff]  ;;  %v570_v3 = vld [vmem:[%s1150_s10] ss:$0 sm:$0xff] }
  0x41   :  { %221 = vmatpush.msra.mxu3 %v188_v19 }
  0x42   :  { %259 = vmatpush.msrb.mxu0 %v232_v2  ;;  %140 = vmatpush.msra.mxu1 %v105_v14 }
  0x43   :  { %222 = vmatpush.msra.mxu3 %v187_v21 }
  0x44   :  { %260 = vmatpush.msrb.mxu0 %v231_v4  ;;  %289 = vmatpush.msrb.mxu1 %v284_v16 }
  0x45   :  { %419 = vmatpush.msrb.mxu3 %v414_v47 }
  0x46   :  { %261 = vmatpush.msrb.mxu0 %v230_v6  ;;  %290 = vmatpush.msrb.mxu1 %v283_v18 }
  0x47   :  { %420 = vmatpush.msrb.mxu3 %v413_v48 }
  0x48   :  { %262 = vmatpush.msrb.mxu0 %v229_v7  ;;  %291 = vmatpush.msrb.mxu1 %v282_v20  ;;  %v571_v7 = vld [vmem:[%s1154_s14] ss:$0 sm:$0xff] }
  0x49   :  { %421 = vmatpush.msrb.mxu3 %v412_v49  ;;  %v377_v49 = vlaneseq }
  0x4a   :  { %263 = vmatpush.msrb.mxu0 %v228_v8  ;;  %292 = vmatpush.msrb.mxu1 %v281_v22 }
  0x4b   :  { %264 = vmatmul.f32.vlgmr.msrb.gmra.mxu0 %v227_v9  ;;  %422 = vmatpush.msrb.mxu3 %v411_v50  ;;  %v380_v50 = vand.u32 127, %v377_v49 }
  0x4c   :  { %293 = vmatpush.msrb.mxu1 %v280_v23 }
  0x4d   :  { %423 = vmatpush.msrb.mxu3 %v410_v51  ;;  %v378_v51 = vshrl.u32 %v377_v49, 7  ;;  %vm382_vm10 = vcmp.lt.s32.totalorder %v380_v50, 8 }
  0x4e   :  { %294 = vmatpush.msrb.mxu1 %v279_v24 }
  0x4f   :  { %424 = vmatpush.msrb.mxu3 %v409_v52  ;;  %vm387_vm9 = vcmp.eq.s32.totalorder %v378_v51, %v380_v50 }
  0x50   :  { %295 = vmatpush.msrb.mxu1 %v278_v25 }
  0x51   :  { %425 = vmatpush.msrb.mxu3 %v408_v53 }
  0x52   :  { %296 = vmatpush.msrb.mxu1 %v277_v26 }
  0x53   :  { %426 = vmatpush.msrb.mxu3 %v407_v54  ;;  %v608_v54 = vmov 0.0  }
  0x54   :  { %297 = vmatpush.msrb.mxu1 %v276_v27 }
  0x55   :  { %427 = vmatpush.msrb.mxu3 %v406_v55  ;;  %v560_v55 = vsel %vm387_vm9, 1.0, %v608_v54 }
  0x56   :  { %298 = vmatpush.msrb.mxu1 %v275_v28 }
  0x57   :  { %428 = vmatpush.msrb.mxu3 %v405_v56 }
  0x58   :  { %299 = vmatpush.msrb.mxu1 %v274_v29 }
  0x59   :  { %429 = vmatpush.msrb.mxu3 %v404_v57 }
  0x5a   :  { %300 = vmatpush.msrb.mxu1 %v273_v30 }
  0x5b   :  { %430 = vmatpush.msrb.mxu3 %v403_v58 }
  0x5c   :  { %301 = vmatpush.msrb.mxu1 %v272_v31 }
  0x5d   :  { %431 = vmatpush.msrb.mxu3 %v402_v59 }
  0x5e   :  { %302 = vmatpush.msrb.mxu1 %v271_v33 }
  0x5f   :  { %432 = vmatpush.msrb.mxu3 %v401_v61 }
  0x60   :  { %303 = vmatpush.msrb.mxu1 %v270_v36 }
  0x61   :  { %433 = vmatpush.msrb.mxu3 %v400_v0  ;;  %v518_v0 = vld [vmem:[%s1157_s17 + $0x78] sm:$0xff] }
  0x62   :  { %304 = vmatpush.msrb.mxu1 %v269_v39  ;;  %523 = vmatpush.msra.mxu0 %v518_v0 }
  0x63   :  { %434 = vmatpush.msrb.mxu3 %v399_v1  ;;  %v517_v1 = vld [vmem:[%s1157_s17 + $0x70] sm:$0xff] }
  0x64   :  { %524 = vmatpush.msra.mxu0 %v517_v1 }
  0xa8   :  { %v101_v34 = vpop.f32.mrf.mxu0 }
  0xa9   :  { %v102_v35 = vadd.f32 %v566_v32, %v101_v34 }
  0xab   :  { %v104_v37 = vmax.f32 %v102_v35, 0.0 }
  0xad   :  { %141 = vmatmul.f32.vlgmr.msra.gmra.mxu1 %v104_v37  ;;  %v183_v40 = vpop.f32.mrf.mxu2  ;;  %v572_v37 = vld [vmem:[%s1156_s16] ss:$0 sm:$0xff] }
  0xae   :  { %v184_v41 = vadd.f32 %v567_v38, %v183_v40 }
  0xb0   :  { %v186_v42 = vmax.f32 %v184_v41, 0.0 }
  0xb2   :  { %223 = vmatmul.f32.vlgmr.msra.gmra.mxu3 %v186_v42 }
  0xc8   :  { %v265_v44 = vpop.f32.mrf.mxu0 }
  0xc9   :  { %v266_v45 = vadd.f32 %v568_v43, %v265_v44 }
  0xcb   :  { %v268_v46 = vmax.f32 %v266_v45, 0.0 }
  0xcd   :  { %305 = vmatmul.f32.vlgmr.msrb.gmra.mxu1 %v268_v46 }
 0x12a   :  { %v142_v62 = vpop.f32.mrf.mxu1 }
 0x12b   :  { %v143_v63 = vadd.f32 %v569_v60, %v142_v62 }
 0x12d   :  { %v309_v2 = vmul.f32 %v143_v63, %v143_v63 }
 0x12f   :  { %310 = vadd.xlane.f32.xlu0 %v309_v2  ;;  %v516_v2 = vld [vmem:[%s1157_s17 + $0x68] sm:$0xff] }
 0x130   :  { %525 = vmatpush.msra.mxu0 %v516_v2 }
 0x135   :  { %v224_v4 = vpop.f32.mrf.mxu3 }
 0x136   :  { %v225_v5 = vadd.f32 %v570_v3, %v224_v4  ;;  %v515_v3 = vld [vmem:[%s1157_s17 + $0x60] sm:$0xff]  ;;  %v514_v4 = vld [vmem:[%s1157_s17 + $0x58] sm:$0xff] }
 0x137   :  { %526 = vmatpush.msra.mxu0 %v515_v3 }
 0x138   :  { %v324_v6 = vmul.f32 %v225_v5, %v225_v5  ;;  %v397_v9 = vadd.f32 %v225_v5, %v143_v63 }
 0x139   :  { %527 = vmatpush.msra.mxu0 %v514_v4 }
 0x13a   :  { %325 = vadd.xlane.f32.xlu0 %v324_v6  ;;  %v512_v6 = vld [vmem:[%s1157_s17 + $0x48] sm:$0xff] }
 0x14a   :  { %v306_v8 = vpop.f32.mrf.mxu1 }
 0x14b   :  { %v307_v10 = vadd.f32 %v571_v7, %v306_v8  ;;  %v511_v7 = vld [vmem:[%s1157_s17 + $0x40] sm:$0xff]  ;;  %v510_v8 = vld [vmem:[%s1157_s17 + $0x38] sm:$0xff] }
 0x14d   :  { %v340_v11 = vmul.f32 %v307_v10, %v307_v10  ;;  %v398_v12 = vadd.f32 %v397_v9, %v307_v10  ;;  %v509_v9 = vld [vmem:[%s1157_s17 + $0x30] sm:$0xff] }
 0x14f   :  { %341 = vadd.xlane.f32.xlu1 %v340_v11  ;;  %435 = vmatmul.f32.vlgmr.msrb.gmra.mxu3 %v398_v12  ;;  %v507_v11 = vld [vmem:[%s1157_s17 + $0x20] sm:$0xff]  ;;  %v506_v12 = vld [vmem:[%s1157_s17 + $0x18] sm:$0xff] }
 0x1a2   :  { %v311_v13 = vpop.xlane.xlu0 %310 }
 0x1a3   :  { %v312_v16 = vadd.f32 1e-08, %v311_v13  ;;  %v505_v13 = vld [vmem:[%s1157_s17 + $0x10] sm:$0xff] }
 0x1a5   :  { %vm319_vm2 = vweird.f32 %v312_v16 }
 0x1ad   :  { %v326_v14 = vpop.xlane.xlu0 %325 }
 0x1ae   :  { %v327_v15 = vadd.f32 1e-08, %v326_v14 }
 0x1b0   :  { %574 = vrsqrt.f32 %v327_v15  ;;  %vm334_vm0 = vweird.f32 %v327_v15 }
 0x1b1   :  { %576 = vrsqrt.f32 %v312_v16 }
 0x1b6   :  { %v575_v17 = vpop.eup %574 }
 0x1b7   :  { %v577_v18 = vpop.eup %576  ;;  %v329_v19 = vmul.f32 %v575_v17, %v327_v15  ;;  %vm335_vm1 = vweird.f32 %v575_v17 }
 0x1b8   :  { %v314_v20 = vmul.f32 %v577_v18, %v312_v16  ;;  %vm320_vm3 = vweird.f32 %v577_v18  ;;  %vm336_vm4 = vmor %vm334_vm0, %vm335_vm1  ;;  %v504_v16 = vld [vmem:[%s1157_s17 + $0x8] sm:$0xff] }
 0x1b9   :  { %v330_v21 = vmul.f32 %v575_v17, %v329_v19  ;;  %vm321_vm5 = vmor %vm319_vm2, %vm320_vm3 }
 0x1ba   :  { %v315_v22 = vmul.f32 %v577_v18, %v314_v20  ;;  %v573_v20 = vld [vmem:[%s1158_s18] ss:$0 sm:$0xff] }
 0x1bb   :  { %v331_v25 = vmul.f32 0.5, %v330_v21 }
 0x1bc   :  { %v316_v26 = vmul.f32 0.5, %v315_v22 }
 0x1bd   :  { %v332_v27 = vsub.f32 1.5, %v331_v25 }
 0x1be   :  { %v317_v28 = vsub.f32 1.5, %v316_v26 }
 0x1bf   :  { %v333_v30 = vmul.f32 %v575_v17, %v332_v27 }
 0x1c0   :  { %v318_v32 = vmul.f32 %v577_v18, %v317_v28 }
 0x1c1   :  { %v337_v35 = vsel %vm336_vm4, %v575_v17, %v333_v30  ;;  %v503_v17 = vld [vmem:[%s1157_s17] sm:$0xff] }
 0x1c2   :  { %v342_v23 = vpop.xlane.xlu1 %341  ;;  %v322_v38 = vsel %vm321_vm5, %v577_v18, %v318_v32  ;;  %v338_v40 = vmul.f32 %v337_v35, %v225_v5  ;;  %v513_v5 = vld [vmem:[%s1157_s17 + $0x50] sm:$0xff] }
 0x1c3   :  { %v343_v24 = vadd.f32 1e-08, %v342_v23  ;;  %v323_v42 = vmul.f32 %v322_v38, %v143_v63  ;;  %528 = vmatpush.msra.mxu0 %v513_v5 }
 0x1c5   :  { %578 = vrsqrt.f32 %v343_v24  ;;  %vm350_vm7 = vweird.f32 %v343_v24  ;;  %v339_v45 = vadd.f32 %v338_v40, %v323_v42  ;;  %529 = vmatpush.msra.mxu0 %v512_v6 }
 0x1c7   :  { %530 = vmatpush.msra.mxu0 %v511_v7 }
 0x1c9   :  { %531 = vmatpush.msra.mxu0 %v510_v8 }
 0x1cb   :  { %v579_v29 = vpop.eup %578  ;;  %532 = vmatpush.msra.mxu0 %v509_v9 }
 0x1cc   :  { %v345_v31 = vmul.f32 %v579_v29, %v343_v24  ;;  %vm351_vm6 = vweird.f32 %v579_v29 }
 0x1cd   :  { %vm352_vm8 = vmor %vm350_vm7, %vm351_vm6 }
 0x1ce   :  { %v346_v33 = vmul.f32 %v579_v29, %v345_v31 }
 0x1d0   :  { %v347_v34 = vmul.f32 0.5, %v346_v33 }
 0x1d2   :  { %v348_v36 = vsub.f32 1.5, %v347_v34  ;;  %v436_v39 = vpop.f32.mrf.mxu3 }
 0x1d3   :  { %v437_v43 = vadd.f32 %v572_v37, %v436_v39 }
 0x1d4   :  { %v349_v41 = vmul.f32 %v579_v29, %v348_v36 }
 0x1d5   :  { %v1076_v48 = vmax.f32 %v437_v43, 0.0 }
 0x1d6   :  { %v353_v44 = vsel %vm352_vm8, %v579_v29, %v349_v41 }
 0x1d7   :  { %v354_v46 = vmul.f32 %v353_v44, %v307_v10  ;;  %v508_v10 = vld [vmem:[%s1157_s17 + $0x28] sm:$0xff] }
 0x1d8   :  { %533 = vmatpush.msra.mxu0 %v508_v10 }
 0x1d9   :  { %v355_v47 = vadd.f32 %v354_v46, %v339_v45 }
 0x1da   :  { %534 = vmatpush.msra.mxu0 %v507_v11 }
 0x1db   :  { %371 = vmatpush.xpose.msrb.mxu2 %v355_v47 }
 0x1dc   :  { %535 = vmatpush.msra.mxu0 %v506_v12 }
 0x1de   :  { %372 = vmatmul.f32.vlgmr.msrb.gmra.mxu2 %v355_v47  ;;  %536 = vmatpush.msra.mxu0 %v505_v13 }
 0x1df   :  { %458 = vmatpush.msra.mxu2 %v1076_v48 }
 0x1e0   :  { %537 = vmatpush.msra.mxu0 %v504_v16 }
 0x1e2   :  { %538 = vmatpush.msra.mxu0 %v503_v17 }
 0x261   :  { %v373_v52 = vpop.f32.mrf.mxu2 }
 0x262   :  { %v376_v53 = vmul.f32 0.33333334, %v373_v52 }
 0x264   :  { %vm384_vm11 = vcmp.gt.f32.partialorder %v376_v53, 0.5 }
 0x265   :  { %vm385_vm12 = vmand %vm384_vm11, %vm382_vm10 }
 0x266   :  { %v386_v56 = vsel %vm385_vm12, 1.0, %v608_v54 }
 0x267   :  { %v390_v57 = vmax.f32 %v386_v56, %v560_v55 }
 0x269   :  { %v392_v58 = vsel %vm391_vm13, %v390_v57, 0.0 }
 0x26a   :  { %393 = vadd.xlane.f32.xlu1 %v392_v58 }
 0x2dd   :  { %v394_v59 = vpop.xlane.xlu1 %393 }
 0x2de   :  { %580 = vrcp.f32 %v394_v59 }
 0x2e4   :  { %v581_v60 = vpop.eup %580 }
 0x2e5   :  { %v396_v61 = vmul.f32 %v581_v60, %v390_v57 }
 0x2e7   :  { %561 = vmatmul.msk.f32.vlgmr.msra.gmra.mxu2 %vm391_vm13, %v396_v61 }
 0x36a   :  { %v460_v62 = vpop.f32.mrf.mxu2 }
 0x36b   :  { %v461_v63 = vadd.f32 %v460_v62, %v1076_v48 }
 0x36d   :  { %478 = vmatpush.msrb.mxu2 %v461_v63 }
 0x36e   :  { %562 = vmatmul.msk.f32.vlgmr.msrb.gmra.mxu2 %vm391_vm13, %v396_v61 }
 0x3f1   :  { %v480_v14 = vpop.f32.mrf.mxu2 }
 0x3f2   :  { %v481_v15 = vadd.f32 %v480_v14, %v1076_v48 }
 0x3f4   :  { %498 = vmatpush.msra.mxu2 %v481_v15 }
 0x3f5   :  { %563 = vmatmul.msk.f32.vlgmr.msra.gmra.mxu2 %vm391_vm13, %v396_v61 }
 0x478   :  { %v500_v18 = vpop.f32.mrf.mxu2 }
 0x479   :  { %v501_v19 = vadd.f32 %v500_v18, %v1076_v48 }
 0x47b   :  { %539 = vmatmul.f32.vlgmr.msra.gmra.mxu0 %v501_v19 }
 0x4f8   :  { %v540_v21 = vpop.f32.mrf.mxu0 }
 0x4f9   :  { %v541_v22 = vadd.f32 %v573_v20, %v540_v21 }
 0x4fb   :  { %543 = vst [vmem:[#allocation2] sm:$0xff] %v541_v22 }
 0x4fc   :  { %554 = dma.vmem_to_hbm [thread:$0]  %s550_s28, 128, %s552_s0, [#allocation3]  }
 0x4fd   :  { %606 = dma.done.wait [#allocation3], 128  }
 0x4fe   :  { %607 = vsyncadd [#allocation3], 4294967168 }
 0x4ff   :  { %559 = vsyncpa [#allocation3], 1 }

</bundles_post_ra>
